<compile_context>
chip_gen: v5e
topology: v5e:2x2
jax: 0.10.0
libtpu: 0.0.40
codegen_flags: <defaults>
</compile_context>

<pallas_src>
import jax
import jax.numpy as jnp
from jax.experimental import pallas as pl
from jax.experimental.pallas import tpu as pltpu

IN_FEATURES = 512
HIDDEN = 120
HIDDEN_PAD = 128   # pad 120 -> 128 for lane-dense vregs / dense MXU tiles
OUT_FEATURES = 2


def _round_up(x, m):
    return (x + m - 1) // m * m


def dc_model_kernel(x_ref, w1_ref, b1_ref, w2_ref, b2_ref, o_ref):
    # Hidden layer: bf16 operands on the MXU, f32 accumulation.
    x_bf = x_ref[...].astype(jnp.bfloat16)
    w1_bf = w1_ref[...].astype(jnp.bfloat16)
    h = jnp.dot(x_bf, w1_bf, preferred_element_type=jnp.float32)
    # Bias + ReLU in f32 on the VPU. Padded hidden lanes have b1 == 0, so they
    # stay exactly 0 after ReLU and (with zero w2 rows) contribute nothing.
    h = jnp.maximum(h + b1_ref[...], 0.0)
    # Output layer: (TB,128) @ (128,2) + (1,2), bf16 operands, f32 accumulate.
    out = jnp.dot(h.astype(jnp.bfloat16), w2_ref[...].astype(jnp.bfloat16),
                  preferred_element_type=jnp.float32)
    o_ref[...] = (out + b2_ref[...]).astype(o_ref.dtype)


def dc_model_forward(x, w1, b1, w2, b2, *, block_b=1024):
    """Forward pass of Dc_model.

    x : (B, 512) f32
    w1: (512, 120) f32   b1: (1, 120) f32
    w2: (120, 2)   f32   b2: (1, 2)   f32
    Returns (B, 2) f32.
    """
    B = x.shape[0]

    # Pad the hidden dimension to 128 once, outside the kernel. Zero pad
    # columns of w1/b1 and zero pad rows of w2 -> mathematically identical.
    w1p = jnp.pad(w1, ((0, 0), (0, HIDDEN_PAD - HIDDEN)))
    b1p = jnp.pad(b1, ((0, 0), (0, HIDDEN_PAD - HIDDEN)))
    w2p = jnp.pad(w2, ((0, HIDDEN_PAD - HIDDEN), (0, 0)))

    # Batch tiling: TB capped at block_b (per-buffer x tile = TB*512*4B;
    # 1024 -> 2 MiB, 4 MiB double-buffered — well under the scoped VMEM limit
    # on all of v5e/v6e/v7x). Pad B so the grid divides evenly.
    TB = min(block_b, _round_up(B, 8))
    Bp = _round_up(B, TB)
    if Bp != B:
        x = jnp.pad(x, ((0, Bp - B), (0, 0)))
    grid = (Bp // TB,)

    flops = 2 * Bp * IN_FEATURES * HIDDEN_PAD + 2 * Bp * HIDDEN_PAD * OUT_FEATURES
    bytes_accessed = (Bp * IN_FEATURES * 4            # x read
                      + IN_FEATURES * HIDDEN_PAD * 4  # w1
                      + HIDDEN_PAD * 4                # b1
                      + HIDDEN_PAD * OUT_FEATURES * 4  # w2
                      + OUT_FEATURES * 4              # b2
                      + Bp * OUT_FEATURES * 4)        # out write

    out = pl.pallas_call(
        dc_model_kernel,
        out_shape=jax.ShapeDtypeStruct((Bp, OUT_FEATURES), jnp.float32),
        grid_spec=pl.GridSpec(
            grid=grid,
            in_specs=[
                # x: tiled along the batch.
                pl.BlockSpec((TB, IN_FEATURES), lambda i: (i, 0)),
                # Weights/biases: constant block index -> stay VMEM-resident.
                pl.BlockSpec((IN_FEATURES, HIDDEN_PAD), lambda i: (0, 0)),
                pl.BlockSpec((1, HIDDEN_PAD), lambda i: (0, 0)),
                pl.BlockSpec((HIDDEN_PAD, OUT_FEATURES), lambda i: (0, 0)),
                pl.BlockSpec((1, OUT_FEATURES), lambda i: (0, 0)),
            ],
            out_specs=pl.BlockSpec((TB, OUT_FEATURES), lambda i: (i, 0)),
        ),
        compiler_params=pltpu.CompilerParams(
            dimension_semantics=("parallel",),
        ),
        cost_estimate=pl.CostEstimate(
            flops=flops, transcendentals=0, bytes_accessed=bytes_accessed),
    )(x, w1p, b1p, w2p, b2)

    return out[:B]


def init_params(key):
    # Deterministic init mimicking nn.Linear's uniform(-1/sqrt(fan_in), +) init.
    k1, k2, k3, k4 = jax.random.split(key, 4)
    lim1 = 1.0 / jnp.sqrt(512.0)
    lim2 = 1.0 / jnp.sqrt(120.0)
    # Stored as (in, out): transpose of PyTorch's (out, in) weight.
    w1 = jax.random.uniform(k1, (512, 120), jnp.float32, -lim1, lim1)
    b1 = jax.random.uniform(k2, (1, 120), jnp.float32, -lim1, lim1)
    w2 = jax.random.uniform(k3, (120, 2), jnp.float32, -lim2, lim2)
    b2 = jax.random.uniform(k4, (1, 2), jnp.float32, -lim2, lim2)
    return w1, b1, w2, b2


if __name__ == "__main__":
    key = jax.random.PRNGKey(0)
    kx, kp = jax.random.split(key)
    B = 8  # small batch for the smoke test
    x = jax.random.normal(kx, (B, 512), jnp.float32)
    w1, b1, w2, b2 = init_params(kp)

    out = dc_model_forward(x, w1, b1, w2, b2)
    out = jax.block_until_ready(out)

    # Reference check (plain f32 JAX). Kernel uses bf16 MXU operands with f32
    # accumulation, so allow a correspondingly looser tolerance.
    ref = jnp.maximum(x @ w1 + b1, 0.0) @ w2 + b2
    assert out.shape == (B, 2)
    assert jnp.allclose(out, ref, atol=5e-2, rtol=5e-2), (
        f"max abs err = {jnp.max(jnp.abs(out - ref))}")
    print("KERNEL_OK")
</pallas_src>

<mosaic_0001>
module attributes {stable_mosaic.version = 11 : i64} {
  func.func @dc_model_kernel(%arg0: i32, %arg1: memref<8x512xf32, #tpu.memory_space<vmem>>, %arg2: memref<512x128xf32, #tpu.memory_space<vmem>>, %arg3: memref<1x128xf32, #tpu.memory_space<vmem>>, %arg4: memref<128x2xf32, #tpu.memory_space<vmem>>, %arg5: memref<1x2xf32, #tpu.memory_space<vmem>>, %arg6: memref<8x2xf32, #tpu.memory_space<vmem>>) attributes {dimension_semantics = [#tpu.dimension_semantics<parallel>], iteration_bounds = array<i64: 1>, scalar_prefetch = 0 : i64, scratch_operands = 0 : i64, tpu.core_type = #tpu.core_type<tc>, window_params = [{transform_indices = @transform_0, window_bounds = array<i64: 8, 512>}, {pipeline_mode = #tpu.pipeline_mode<synchronous>, transform_indices = @transform_1, window_bounds = array<i64: 512, 128>}, {pipeline_mode = #tpu.pipeline_mode<synchronous>, transform_indices = @transform_2, window_bounds = array<i64: 1, 128>}, {pipeline_mode = #tpu.pipeline_mode<synchronous>, transform_indices = @transform_3, window_bounds = array<i64: 128, 2>}, {pipeline_mode = #tpu.pipeline_mode<synchronous>, transform_indices = @transform_4, window_bounds = array<i64: 1, 2>}, {transform_indices = @transform_5, window_bounds = array<i64: 8, 2>}]} {
    %c0 = arith.constant 0 : index
    %c0_0 = arith.constant 0 : index
    %0 = vector.load %arg1[%c0, %c0_0] : memref<8x512xf32, #tpu.memory_space<vmem>>, vector<8x512xf32>
    %1 = arith.truncf %0 : vector<8x512xf32> to vector<8x512xbf16>
    %c0_1 = arith.constant 0 : index
    %c0_2 = arith.constant 0 : index
    %2 = vector.load %arg2[%c0_1, %c0_2] : memref<512x128xf32, #tpu.memory_space<vmem>>, vector<512x128xf32>
    %3 = arith.truncf %2 : vector<512x128xf32> to vector<512x128xbf16>
    %cst = arith.constant dense<0.000000e+00> : vector<8x128xf32>
    %4 = tpu.matmul %1, %3, %cst {dimension_numbers = #tpu.dot_dimension_numbers<[1], [0], [0], [1], [0, 0, 1, 1], [], []>} : vector<8x512xbf16>, vector<512x128xbf16>, vector<8x128xf32> -> vector<8x128xf32>
    %c0_3 = arith.constant 0 : index
    %c0_4 = arith.constant 0 : index
    %5 = vector.load %arg3[%c0_3, %c0_4] : memref<1x128xf32, #tpu.memory_space<vmem>>, vector<1x128xf32>
    %6 = vector.broadcast %5 : vector<1x128xf32> to vector<8x128xf32>
    %7 = arith.addf %4, %6 : vector<8x128xf32>
    %cst_5 = arith.constant 0.000000e+00 : f32
    %8 = vector.broadcast %cst_5 : f32 to vector<8x128xf32>
    %9 = arith.maximumf %7, %8 : vector<8x128xf32>
    %10 = arith.truncf %9 : vector<8x128xf32> to vector<8x128xbf16>
    %c0_6 = arith.constant 0 : index
    %c0_7 = arith.constant 0 : index
    %11 = vector.load %arg4[%c0_6, %c0_7] : memref<128x2xf32, #tpu.memory_space<vmem>>, vector<128x2xf32>
    %12 = arith.truncf %11 : vector<128x2xf32> to vector<128x2xbf16>
    %cst_8 = arith.constant dense<0.000000e+00> : vector<8x2xf32>
    %13 = tpu.matmul %10, %12, %cst_8 {dimension_numbers = #tpu.dot_dimension_numbers<[1], [0], [0], [1], [0, 0, 1, 1], [], []>} : vector<8x128xbf16>, vector<128x2xbf16>, vector<8x2xf32> -> vector<8x2xf32>
    %c0_9 = arith.constant 0 : index
    %c0_10 = arith.constant 0 : index
    %14 = vector.load %arg5[%c0_9, %c0_10] : memref<1x2xf32, #tpu.memory_space<vmem>>, vector<1x2xf32>
    %15 = vector.broadcast %14 : vector<1x2xf32> to vector<8x2xf32>
    %16 = arith.addf %13, %15 : vector<8x2xf32>
    %c0_11 = arith.constant 0 : index
    %c0_12 = arith.constant 0 : index
    %17 = vector.load %arg6[%c0_11, %c0_12] : memref<8x2xf32, #tpu.memory_space<vmem>>, vector<8x2xf32>
    tpu.vector_store %arg6[%c0_11, %c0_12], %16 {strides = array<i32>} : memref<8x2xf32, #tpu.memory_space<vmem>>, vector<8x2xf32>,
    return
  }
  func.func @transform_0(%arg0: i32) -> (i32, i32) {
    %c0_i32 = arith.constant 0 : i32
    %c0_i32_0 = arith.constant 0 : i32
    return %arg0, %c0_i32 : i32, i32
  }
  func.func @transform_1(%arg0: i32) -> (i32, i32) {
    %c0_i32 = arith.constant 0 : i32
    %c0_i32_0 = arith.constant 0 : i32
    %c0_i32_1 = arith.constant 0 : i32
    return %c0_i32, %c0_i32_0 : i32, i32
  }
  func.func @transform_2(%arg0: i32) -> (i32, i32) {
    %c0_i32 = arith.constant 0 : i32
    %c0_i32_0 = arith.constant 0 : i32
    %c0_i32_1 = arith.constant 0 : i32
    return %c0_i32, %c0_i32_0 : i32, i32
  }
  func.func @transform_3(%arg0: i32) -> (i32, i32) {
    %c0_i32 = arith.constant 0 : i32
    %c0_i32_0 = arith.constant 0 : i32
    %c0_i32_1 = arith.constant 0 : i32
    return %c0_i32, %c0_i32_0 : i32, i32
  }
  func.func @transform_4(%arg0: i32) -> (i32, i32) {
    %c0_i32 = arith.constant 0 : i32
    %c0_i32_0 = arith.constant 0 : i32
    %c0_i32_1 = arith.constant 0 : i32
    return %c0_i32, %c0_i32_0 : i32, i32
  }
  func.func @transform_5(%arg0: i32) -> (i32, i32) {
    %c0_i32 = arith.constant 0 : i32
    %c0_i32_0 = arith.constant 0 : i32
    return %arg0, %c0_i32 : i32, i32
  }
}

</mosaic_0001>

<bundles_post_ra>
// kernel: tpu_custom_call.1
= control target key start
LH: loop header
LB: loop body
LE: loop exit
PB: predicated region body
PF: predicated region fallthrough
CT: control target
= control target key end

     0   :  { %10 = vsyncpa [#allocation3], 0  ;;  %s277_s21 = smov [#allocation2]   ;;  %s278_s23 = smov 128   ;;  %s382_s0 = inlined_call_operand.vmem [shape: f32[8,512], index: 0, kind: input, shape index: {}]   ;;  %s383_s1 = inlined_call_operand.hbm [shape: f32[512,128], index: 1, kind: input, shape index: {}]   ;;  %s384_s2 = inlined_call_operand.vmem [shape: f32[1,128], index: 2, kind: input, shape index: {}]   ;;  %s385_s3 = inlined_call_operand.vmem [shape: f32[128,2], index: 3, kind: input, shape index: {}]   ;;  %s386_s4 = inlined_call_operand.vmem [shape: f32[1,2], index: 4, kind: input, shape index: {}]   ;;  %s387_s5 = inlined_call_operand.vmem [shape: f32[8,2], index: 5, kind: output, shape index: {}]  }
   0x1   :  { %s17_s20 = sshll.u32 %s383_s1, 4  ;;  %s19_s22 = sshll.u32 %s277_s21, 4  ;;  %s18_s20 = int_to_ptr.hbm [resolvable:$true] %s17_s20  ;;  %s20_s22 = int_to_ptr.vmem [resolvable:$true] %s19_s22 }
   0x2   :  { %s279_s24 = smov 8  }
   0x3   :  { %25 = dma.hbm_to_vmem [thread:$0]  %s18_s20, 8192, %s20_s22, [#allocation3], %s278_s23, %s278_s23, %s279_s24  }
   0x4   :  { %275 = dma.done.wait [#allocation3], 8192  }
   0x5   :  { %276 = vsyncadd [#allocation3], 4294959104  ;;  %v58_v0 = vld [vmem:[#allocation2 + $0x70] sm:$0xff]  ;;  %v59_v1 = vld [vmem:[#allocation2 + $0x78] sm:$0xff]  ;;  %vm239_vm0 = vcmask 15360  }
   0x6   :  { %v74_v2 = vld [vmem:[#allocation2 + $0xf0] sm:$0xff]  ;;  %v115_v3 = vpack.c.bf16 %v59_v1, %v58_v0  ;;  %v75_v4 = vld [vmem:[#allocation2 + $0xf8] sm:$0xff]  ;;  %v56_v11 = vld [vmem:[#allocation2 + $0x60] sm:$0xff] }
   0x7   :  { %v90_v5 = vld [vmem:[#allocation2 + $0x170] sm:$0xff]  ;;  %v91_v6 = vld [vmem:[#allocation2 + $0x178] sm:$0xff]  ;;  %v123_v7 = vpack.c.bf16 %v75_v4, %v74_v2  ;;  %v57_v13 = vld [vmem:[#allocation2 + $0x68] sm:$0xff] }
   0x8   :  { %v131_v8 = vpack.c.bf16 %v91_v6, %v90_v5  ;;  %v106_v9 = vld [vmem:[#allocation2 + $0x1f0] sm:$0xff]  ;;  %v107_v10 = vld [vmem:[#allocation2 + $0x1f8] sm:$0xff]  ;;  %144 = vmatpush.bf16.msra.mxu0 %v115_v3  ;;  %v72_v14 = vld [vmem:[#allocation2 + $0xe0] sm:$0xff]  ;;  %v114_v16 = vpack.c.bf16 %v57_v13, %v56_v11 }
   0x9   :  { %v139_v12 = vpack.c.bf16 %v107_v10, %v106_v9  ;;  %v73_v15 = vld [vmem:[#allocation2 + $0xe8] sm:$0xff]  ;;  %157 = vmatpush.bf16.msra.mxu1 %v123_v7  ;;  %v88_v18 = vld [vmem:[#allocation2 + $0x160] sm:$0xff]  ;;  %v54_v23 = vld [vmem:[#allocation2 + $0x50] sm:$0xff] }
   0xa   :  { %170 = vmatpush.bf16.msra.mxu2 %v131_v8  ;;  %v122_v17 = vpack.c.bf16 %v73_v15, %v72_v14  ;;  %v89_v19 = vld [vmem:[#allocation2 + $0x168] sm:$0xff]  ;;  %v104_v20 = vld [vmem:[#allocation2 + $0x1e0] sm:$0xff]  ;;  %v55_v24 = vld [vmem:[#allocation2 + $0x58] sm:$0xff] }
   0xb   :  { %183 = vmatpush.bf16.msra.mxu3 %v139_v12  ;;  %v130_v21 = vpack.c.bf16 %v89_v19, %v88_v18  ;;  %v105_v22 = vld [vmem:[#allocation2 + $0x1e8] sm:$0xff]  ;;  %v70_v26 = vld [vmem:[#allocation2 + $0xd0] sm:$0xff]  ;;  %v71_v27 = vld [vmem:[#allocation2 + $0xd8] sm:$0xff]  ;;  %v113_v29 = vpack.c.bf16 %v55_v24, %v54_v23 }
   0xc   :  { %v138_v25 = vpack.c.bf16 %v105_v22, %v104_v20  ;;  %v86_v28 = vld [vmem:[#allocation2 + $0x150] sm:$0xff]  ;;  %145 = vmatpush.bf16.msra.mxu0 %v114_v16  ;;  %v87_v30 = vld [vmem:[#allocation2 + $0x158] sm:$0xff]  ;;  %v121_v33 = vpack.c.bf16 %v71_v27, %v70_v26  ;;  %v52_v35 = vld [vmem:[#allocation2 + $0x40] sm:$0xff] }
   0xd   :  { %v102_v31 = vld [vmem:[#allocation2 + $0x1d0] sm:$0xff]  ;;  %v103_v32 = vld [vmem:[#allocation2 + $0x1d8] sm:$0xff]  ;;  %158 = vmatpush.bf16.msra.mxu1 %v122_v17  ;;  %v129_v34 = vpack.c.bf16 %v87_v30, %v86_v28  ;;  %v53_v36 = vld [vmem:[#allocation2 + $0x48] sm:$0xff] }
   0xe   :  { %171 = vmatpush.bf16.msra.mxu2 %v130_v21  ;;  %v68_v37 = vld [vmem:[#allocation2 + $0xc0] sm:$0xff]  ;;  %v137_v38 = vpack.c.bf16 %v103_v32, %v102_v31  ;;  %v69_v39 = vld [vmem:[#allocation2 + $0xc8] sm:$0xff]  ;;  %v112_v44 = vpack.c.bf16 %v53_v36, %v52_v35  ;;  %v50_v47 = vld [vmem:[#allocation2 + $0x30] sm:$0xff] }
   0xf   :  { %184 = vmatpush.bf16.msra.mxu3 %v138_v25  ;;  %v84_v40 = vld [vmem:[#allocation2 + $0x140] sm:$0xff]  ;;  %v85_v41 = vld [vmem:[#allocation2 + $0x148] sm:$0xff]  ;;  %v120_v45 = vpack.c.bf16 %v69_v39, %v68_v37  ;;  %v51_v48 = vld [vmem:[#allocation2 + $0x38] sm:$0xff] }
  0x10   :  { %v100_v42 = vld [vmem:[#allocation2 + $0x1c0] sm:$0xff]  ;;  %v101_v43 = vld [vmem:[#allocation2 + $0x1c8] sm:$0xff]  ;;  %146 = vmatpush.bf16.msra.mxu0 %v113_v29  ;;  %v128_v46 = vpack.c.bf16 %v85_v41, %v84_v40  ;;  %v66_v49 = vld [vmem:[#allocation2 + $0xb0] sm:$0xff]  ;;  %v111_v56 = vpack.c.bf16 %v51_v48, %v50_v47 }
  0x11   :  { %159 = vmatpush.bf16.msra.mxu1 %v121_v33  ;;  %v136_v50 = vpack.c.bf16 %v101_v43, %v100_v42  ;;  %v67_v51 = vld [vmem:[#allocation2 + $0xb8] sm:$0xff]  ;;  %v82_v52 = vld [vmem:[#allocation2 + $0x130] sm:$0xff]  ;;  %v48_v59 = vld [vmem:[#allocation2 + $0x20] sm:$0xff] }
  0x12   :  { %172 = vmatpush.bf16.msra.mxu2 %v129_v34  ;;  %v83_v53 = vld [vmem:[#allocation2 + $0x138] sm:$0xff]  ;;  %v98_v54 = vld [vmem:[#allocation2 + $0x1b0] sm:$0xff]  ;;  %v119_v57 = vpack.c.bf16 %v67_v51, %v66_v49  ;;  %v49_v60 = vld [vmem:[#allocation2 + $0x28] sm:$0xff] }
  0x13   :  { %185 = vmatpush.bf16.msra.mxu3 %v137_v38  ;;  %v99_v55 = vld [vmem:[#allocation2 + $0x1b8] sm:$0xff]  ;;  %v127_v58 = vpack.c.bf16 %v83_v53, %v82_v52  ;;  %v64_v61 = vld [vmem:[#allocation2 + $0xa0] sm:$0xff]  ;;  %v65_v63 = vld [vmem:[#allocation2 + $0xa8] sm:$0xff]  ;;  %v110_v4 = vpack.c.bf16 %v49_v60, %v48_v59 }
  0x14   :  { %147 = vmatpush.bf16.msra.mxu0 %v112_v44  ;;  %v135_v62 = vpack.c.bf16 %v99_v55, %v98_v54  ;;  %v80_v0 = vld [vmem:[#allocation2 + $0x120] sm:$0xff]  ;;  %v81_v1 = vld [vmem:[#allocation2 + $0x128] sm:$0xff]  ;;  %v118_v5 = vpack.c.bf16 %v65_v63, %v64_v61  ;;  %v46_v7 = vld [vmem:[#allocation2 + $0x10] sm:$0xff] }
  0x15   :  { %160 = vmatpush.bf16.msra.mxu1 %v120_v45  ;;  %v96_v2 = vld [vmem:[#allocation2 + $0x1a0] sm:$0xff]  ;;  %v97_v3 = vld [vmem:[#allocation2 + $0x1a8] sm:$0xff]  ;;  %v126_v6 = vpack.c.bf16 %v81_v1, %v80_v0  ;;  %v47_v8 = vld [vmem:[#allocation2 + $0x18] sm:$0xff] }
  0x16   :  { %173 = vmatpush.bf16.msra.mxu2 %v128_v46  ;;  %v62_v9 = vld [vmem:[#allocation2 + $0x90] sm:$0xff]  ;;  %v134_v10 = vpack.c.bf16 %v97_v3, %v96_v2  ;;  %v63_v11 = vld [vmem:[#allocation2 + $0x98] sm:$0xff]  ;;  %v109_v16 = vpack.c.bf16 %v47_v8, %v46_v7  ;;  %v44_v17 = vld [vmem:[#allocation2] sm:$0xff] }
  0x17   :  { %186 = vmatpush.bf16.msra.mxu3 %v136_v50  ;;  %v78_v12 = vld [vmem:[#allocation2 + $0x110] sm:$0xff]  ;;  %v79_v13 = vld [vmem:[#allocation2 + $0x118] sm:$0xff]  ;;  %v45_v18 = vld [vmem:[#allocation2 + $0x8] sm:$0xff]  ;;  %v117_v20 = vpack.c.bf16 %v63_v11, %v62_v9 }
  0x18   :  { %148 = vmatpush.bf16.msra.mxu0 %v111_v56  ;;  %v94_v14 = vld [vmem:[#allocation2 + $0x190] sm:$0xff]  ;;  %v95_v15 = vld [vmem:[#allocation2 + $0x198] sm:$0xff]  ;;  %v60_v19 = vld [vmem:[#allocation2 + $0x80] sm:$0xff]  ;;  %v125_v21 = vpack.c.bf16 %v79_v13, %v78_v12  ;;  %v108_v30 = vpack.c.bf16 %v45_v18, %v44_v17 }
  0x19   :  { %161 = vmatpush.bf16.msra.mxu1 %v119_v57  ;;  %v61_v22 = vld [vmem:[#allocation2 + $0x88] sm:$0xff]  ;;  %v76_v23 = vld [vmem:[#allocation2 + $0x100] sm:$0xff]  ;;  %v133_v25 = vpack.c.bf16 %v95_v15, %v94_v14  ;;  %v212_v28 = vld [vmem:[%s385_s3 + $0x70] sm:$0xff] }
  0x1a   :  { %174 = vmatpush.bf16.msra.mxu2 %v127_v58  ;;  %v77_v24 = vld [vmem:[#allocation2 + $0x108] sm:$0xff]  ;;  %v92_v26 = vld [vmem:[#allocation2 + $0x180] sm:$0xff]  ;;  %v213_v29 = vld [vmem:[%s385_s3 + $0x78] sm:$0xff]  ;;  %v116_v32 = vpack.c.bf16 %v61_v22, %v60_v19 }
  0x1b   :  { %187 = vmatpush.bf16.msra.mxu3 %v135_v62  ;;  %v93_v27 = vld [vmem:[#allocation2 + $0x188] sm:$0xff]  ;;  %v36_v31 = vld [vmem:[%s382_s0] sm:$0xff]  ;;  %v124_v33 = vpack.c.bf16 %v77_v24, %v76_v23  ;;  %v38_v35 = vld [vmem:[%s382_s0 + $0x10] sm:$0xff]  ;;  %v221_v38 = vpack.c.bf16 %v213_v29, %v212_v28 }
  0x1c   :  { %149 = vmatpush.bf16.msra.mxu0 %v110_v4  ;;  %v37_v34 = vld [vmem:[%s382_s0 + $0x8] sm:$0xff]  ;;  %v132_v36 = vpack.c.bf16 %v93_v27, %v92_v26  ;;  %v39_v37 = vld [vmem:[%s382_s0 + $0x18] sm:$0xff]  ;;  %v40_v39 = vpack.c.bf16 %v36_v31, %v36_v31  ;;  %v210_v40 = vld [vmem:[%s385_s3 + $0x60] sm:$0xff]  ;;  %v42_v43 = vpack.c.bf16 %v38_v35, %v38_v35 }
  0x1d   :  { %162 = vmatpush.bf16.msra.mxu1 %v118_v5  ;;  %v211_v41 = vld [vmem:[%s385_s3 + $0x68] sm:$0xff]  ;;  %v41_v42 = vpack.c.bf16 %v37_v34, %v37_v34  ;;  %v43_v44 = vpack.c.bf16 %v39_v37, %v39_v37  ;;  %v208_v46 = vld [vmem:[%s385_s3 + $0x50] sm:$0xff]  ;;  %v209_v47 = vld [vmem:[%s385_s3 + $0x58] sm:$0xff] }
  0x1e   :  { %175 = vmatpush.bf16.msra.mxu2 %v126_v6  ;;  %v220_v45 = vpack.c.bf16 %v211_v41, %v210_v40  ;;  %v219_v48 = vpack.c.bf16 %v209_v47, %v208_v46  ;;  %v206_v49 = vld [vmem:[%s385_s3 + $0x40] sm:$0xff]  ;;  %v207_v50 = vld [vmem:[%s385_s3 + $0x48] sm:$0xff]  ;;  %v204_v52 = vld [vmem:[%s385_s3 + $0x30] sm:$0xff] }
  0x1f   :  { %188 = vmatpush.bf16.msra.mxu3 %v134_v10  ;;  %v218_v51 = vpack.c.bf16 %v207_v50, %v206_v49  ;;  %v205_v53 = vld [vmem:[%s385_s3 + $0x38] sm:$0xff]  ;;  %v202_v55 = vld [vmem:[%s385_s3 + $0x20] sm:$0xff]  ;;  %v203_v56 = vld [vmem:[%s385_s3 + $0x28] sm:$0xff] }
  0x20   :  { %150 = vmatpush.bf16.msra.mxu0 %v109_v16  ;;  %v217_v54 = vpack.c.bf16 %v205_v53, %v204_v52  ;;  %v216_v57 = vpack.c.bf16 %v203_v56, %v202_v55  ;;  %v200_v58 = vld [vmem:[%s385_s3 + $0x10] sm:$0xff]  ;;  %v201_v59 = vld [vmem:[%s385_s3 + $0x18] sm:$0xff]  ;;  %v198_v61 = vld [vmem:[%s385_s3] sm:$0xff] }
  0x21   :  { %163 = vmatpush.bf16.msra.mxu1 %v117_v20  ;;  %v215_v60 = vpack.c.bf16 %v201_v59, %v200_v58  ;;  %v199_v62 = vld [vmem:[%s385_s3 + $0x8] sm:$0xff]  ;;  %v249_v0 = vld [vmem:[%s384_s2] ss:$0 sm:$0xff] }
  0x22   :  { %176 = vmatpush.bf16.msra.mxu2 %v125_v21  ;;  %v214_v63 = vpack.c.bf16 %v199_v62, %v198_v61  ;;  %v250_v15 = vld [vmem:[%s386_s4] ss:$0 sm:$0xff] }
  0x23   :  { %189 = vmatpush.bf16.msra.mxu3 %v133_v25 }
  0x24   :  { %151 = vmatpush.bf16.msra.mxu0 %v108_v30 }
  0x25   :  { %164 = vmatpush.bf16.msra.mxu1 %v116_v32 }
  0x26   :  { %177 = vmatpush.bf16.msra.mxu2 %v124_v33 }
  0x27   :  { %190 = vmatpush.bf16.msra.mxu3 %v132_v36  ;;  %152 = vmatmul.bf16.vlgmr.msra.gmra.mxu0 %v40_v39 }
  0x28   :  { %226 = vmatpush.bf16.msrb.mxu0 %v221_v38  ;;  %165 = vmatmul.bf16.vlgmr.msra.gmra.mxu1 %v41_v42 }
  0x29   :  { %178 = vmatmul.bf16.vlgmr.msra.gmra.mxu2 %v42_v43 }
  0x2a   :  { %191 = vmatmul.bf16.vlgmr.msra.gmra.mxu3 %v43_v44 }
  0x2c   :  { %227 = vmatpush.bf16.msrb.mxu0 %v220_v45 }
  0x30   :  { %228 = vmatpush.bf16.msrb.mxu0 %v219_v48 }
  0x34   :  { %229 = vmatpush.bf16.msrb.mxu0 %v218_v51 }
  0x38   :  { %230 = vmatpush.bf16.msrb.mxu0 %v217_v54 }
  0x3c   :  { %231 = vmatpush.bf16.msrb.mxu0 %v216_v57 }
  0x40   :  { %232 = vmatpush.bf16.msrb.mxu0 %v215_v60 }
  0x44   :  { %233 = vmatpush.bf16.msrb.mxu0 %v214_v63 }
  0xa4   :  { %v153_v1 = vpop.f32.mrf.mxu0 }
  0xa5   :  { %v154_v2 = vadd.f32 %v249_v0, %v153_v1  ;;  %v166_v3 = vpop.f32.mrf.mxu1 }
  0xa7   :  { %v167_v4 = vadd.f32 %v166_v3, %v154_v2 }
  0xac   :  { %v179_v5 = vpop.f32.mrf.mxu2  ;;  %v155_v8 = vpop.f32.mrf.mxu0 }
  0xad   :  { %v180_v6 = vadd.f32 %v179_v5, %v167_v4  ;;  %v192_v7 = vpop.f32.mrf.mxu3  ;;  %v168_v9 = vpop.f32.mrf.mxu1 }
  0xaf   :  { %v193_v10 = vadd.f32 %v192_v7, %v180_v6 }
  0xb1   :  { %v196_v11 = vmax.f32 %v193_v10, 0.0 }
  0xb3   :  { %v197_v12 = vpack.c.bf16 %v196_v11, %v196_v11 }
  0xb4   :  { %v181_v13 = vpop.f32.mrf.mxu2 }
  0xb5   :  { %v194_v14 = vpop.f32.mrf.mxu3  ;;  %234 = vmatmul.bf16.vlgmr.msrb.gmra.mxu0 %v197_v12 }
 0x132   :  { %v235_v16 = vpop.f32.mrf.mxu0 }
 0x133   :  { %v236_v17 = vadd.f32 %v250_v15, %v235_v16 }
 0x135   :  { %240 = vst.msk [vmem:[%s387_s5] sm:$0xff] %vm239_vm0, %v236_v17 }
 0x13a   :  { %v237_v18 = vpop.f32.mrf.mxu0 }
 0x13b   :  { %245 = vsyncpa [#allocation3], 1 }

</bundles_post_ra>
